<compile_context>
chip_gen: v7x
topology: tpu7x:2x2x1
jax: 0.10.0
libtpu: 0.0.40
codegen_flags: <defaults>
</compile_context>

<pallas_src>
import functools

import jax
import jax.numpy as jnp
from jax.experimental import pallas as pl
from jax.experimental.pallas import tpu as pltpu


def _round_up(x, m):
    return (x + m - 1) // m * m


def _prediction_kernel(x_ref, wh_ref, sh_ref, woh_ref, cpart_ref, out_ref, *, V):
    """One row tile of the fused PredictionLayer forward.

    x_ref     : (tm, H)   f32  input rows (streamed; cast to bf16 in-register)
    wh_ref    : (H, EH)   bf16 enc_h weight with BN scale folded in (resident)
    sh_ref    : (1, EH)   f32  folded Linear bias + BN shift (resident)
    woh_ref   : (EH, OUT) f32  out-Linear columns acting on the enc_h half
    cpart_ref : (N, OUT)  f32  enc_c contribution + out bias, one row per batch
    out_ref   : (tm, OUT) f32  output rows (OUT == full last dim of the output)
    """
    tm = x_ref.shape[0]
    n_batch = cpart_ref.shape[0]

    # enc_h: Linear (BN scale folded into W) -> +shift -> ReLU; bf16 MXU, f32 acc.
    xb = x_ref[...].astype(wh_ref.dtype)
    h = jnp.dot(xb, wh_ref[...], preferred_element_type=jnp.float32)
    h = jnp.maximum(h + sh_ref[...], 0.0)                              # (tm, EH)

    # out-Linear restricted to the enc_h half (OUT is tiny; keep it in f32).
    o = jnp.dot(h, woh_ref[...], preferred_element_type=jnp.float32)   # (tm, OUT)

    # Per-row enc_c addend with zero HBM traffic: row r of this tile belongs to
    # batch b iff b*V <= global_row < (b+1)*V; build that one-hot in-register
    # and contract it with the resident cpart (comparisons only, no int div).
    r0 = pl.program_id(0) * tm
    rows = r0 + jax.lax.broadcasted_iota(jnp.int32, (tm, n_batch), 0)
    lo = jax.lax.broadcasted_iota(jnp.int32, (tm, n_batch), 1) * V
    sel = jnp.logical_and(rows >= lo, rows < lo + V).astype(jnp.float32)
    addend = jnp.dot(sel, cpart_ref[...], preferred_element_type=jnp.float32)

    out_ref[...] = (o + addend).astype(out_ref.dtype)


def prediction_layer(x, one_hots_c, params, *, tm=8192,
                     compute_dtype=jnp.bfloat16):
    """x: (N, V, H) f32, one_hots_c: (N, nc) f32 -> (N, V, out_dim) f32."""
    N, V, H = x.shape
    M = N * V
    eps = 1e-5

    wh, bh, gh, beh, mh, vh = params["enc_h"]
    wc, bc, gc, bec, mc, vc = params["enc_c"]
    out_w, out_b = params["out_w"], params["out_b"]
    EH = wh.shape[0]
    OUT = out_w.shape[0]

    # --- fold BN (inference stats) into the enc_h Linear weight / one shift ---
    s_h = gh / jnp.sqrt(vh + eps)                               # (EH,)
    wh_s = (wh.T * s_h[None, :]).astype(compute_dtype)          # (H, EH) bf16
    shift_h = (bh * s_h + beh - mh * s_h)[None, :]              # (1, EH) f32
    shift_h = shift_h.astype(jnp.float32)

    # --- enc_c depends only on the batch index: hoist it out of the kernel ---
    s_c = gc / jnp.sqrt(vc + eps)
    c = jnp.maximum(one_hots_c @ (wc.T * s_c[None, :])
                    + (bc * s_c + bec - mc * s_c)[None, :], 0.0)   # (N, EC)
    cpart = (c @ out_w[:, EH:].T + out_b[None, :]).astype(jnp.float32)  # (N, OUT)

    woh = out_w[:, :EH].T.astype(jnp.float32)                      # (EH, OUT)

    # --- row tiling -----------------------------------------------------------
    tm_eff = int(tm)
    # v7x megacore: keep >=4 parallel grid steps when there is enough work.
    tm_eff = min(tm_eff, _round_up(pl.cdiv(M, 4), 128))
    # Double-buffered f32 x-tile + out-tile under ~12 MiB (fits every
    # generation's default scoped VMEM limit without flags).
    row_bytes = 4 * (H + OUT)
    tm_eff = min(tm_eff, max(8, (12 << 20) // (2 * row_bytes)))
    tm_eff = min(tm_eff, _round_up(M, 8))
    tm_eff = max(8, _round_up(tm_eff, 8))
    grid = pl.cdiv(M, tm_eff)

    x2 = x.reshape(M, H)   # free reshape: no cast, no pad pass

    kern = functools.partial(_prediction_kernel, V=V)
    out = pl.pallas_call(
        kern,
        out_shape=jax.ShapeDtypeStruct((M, OUT), jnp.float32),
        grid_spec=pltpu.PrefetchScalarGridSpec(
            num_scalar_prefetch=0,
            grid=(grid,),
            in_specs=[
                pl.BlockSpec((tm_eff, H), lambda i: (i, 0)),    # x rows (f32)
                pl.BlockSpec((H, EH), lambda i: (0, 0)),        # folded enc_h W
                pl.BlockSpec((1, EH), lambda i: (0, 0)),        # folded shift
                pl.BlockSpec((EH, OUT), lambda i: (0, 0)),      # out W (h half)
                pl.BlockSpec((N, OUT), lambda i: (0, 0)),       # enc_c part + bias
            ],
            out_specs=pl.BlockSpec((tm_eff, OUT), lambda i: (i, 0)),
        ),
        compiler_params=pltpu.CompilerParams(
            dimension_semantics=("parallel",)),
    )(x2, wh_s, shift_h, woh, cpart)

    return out.reshape(N, V, OUT)


def init_params(key, h_dim, e_h_dim, e_c_dim, nc, out_dim):
    ks = jax.random.split(key, 14)
    f32 = jnp.float32

    def linear(kw, kb, fan_in, fan_out):
        lim = 1.0 / jnp.sqrt(fan_in)
        w = jax.random.uniform(kw, (fan_out, fan_in), f32, -lim, lim)  # torch (out,in)
        b = jax.random.uniform(kb, (fan_out,), f32, -lim, lim)
        return w, b

    def bn(kg, kb, km, kv, dim):
        gamma = 1.0 + 0.1 * jax.random.normal(kg, (dim,), f32)
        beta = 0.1 * jax.random.normal(kb, (dim,), f32)
        mean = 0.1 * jax.random.normal(km, (dim,), f32)
        var = jnp.abs(jax.random.normal(kv, (dim,), f32)) + 0.5
        return gamma, beta, mean, var

    wh, bh = linear(ks[0], ks[1], h_dim, e_h_dim)
    gh, beh, mh, vh = bn(ks[2], ks[3], ks[4], ks[5], e_h_dim)
    wc, bc = linear(ks[6], ks[7], nc, e_c_dim)
    gc, bec, mc, vc = bn(ks[8], ks[9], ks[10], ks[11], e_c_dim)
    wo, bo = linear(ks[12], ks[13], e_h_dim + e_c_dim, out_dim)

    return {
        "enc_h": (wh, bh, gh, beh, mh, vh),
        "enc_c": (wc, bc, gc, bec, mc, vc),
        "out_w": wo,
        "out_b": bo,
    }


def reference(x, one_hots_c, params):
    """Pure-JAX f32 reference of the PyTorch forward (inference-mode BN)."""
    N, V, H = x.shape
    nc = one_hots_c.shape[1]
    eps = 1e-5

    def enc(z, p):
        w, b, g, be, m, v = p
        y = z @ w.T + b
        y = g * (y - m) / jnp.sqrt(v + eps) + be
        return jnp.maximum(y, 0.0)

    x2 = x.reshape(N * V, H)
    oh2 = jnp.broadcast_to(one_hots_c[:, None, :], (N, V, nc)).reshape(N * V, nc)
    h = enc(x2, params["enc_h"])
    c = enc(oh2, params["enc_c"])
    cat = jnp.concatenate([h, c], axis=1)
    out = cat @ params["out_w"].T + params["out_b"]
    return out.reshape(N, V, -1)


def _run_case(key, N, V, h_dim, e_h_dim, e_c_dim, nc, out_dim, tm):
    kx, koh, kp = jax.random.split(key, 3)
    x = jax.random.normal(kx, (N, V, h_dim), jnp.float32)
    one_hots_c = jax.nn.one_hot(
        jax.random.randint(koh, (N,), 0, nc), nc, dtype=jnp.float32)
    params = init_params(kp, h_dim, e_h_dim, e_c_dim, nc, out_dim)

    out = prediction_layer(x, one_hots_c, params, tm=tm)
    out = jax.block_until_ready(out)
    ref = reference(x, one_hots_c, params)

    assert out.shape == (N, V, out_dim)
    # bf16 MXU inputs with f32 accumulation: compare to f32 reference loosely.
    assert jnp.allclose(out, ref, atol=5e-2, rtol=5e-2), (
        f"mismatch vs reference: max abs err={float(jnp.max(jnp.abs(out - ref)))}")


if __name__ == "__main__":
    key = jax.random.PRNGKey(0)
    k1, k2 = jax.random.split(key)

    # Small case matching the module's default-ish dims (single grid step).
    _run_case(k1, N=2, V=8, h_dim=32, e_h_dim=32, e_c_dim=32, nc=5, out_dim=5,
              tm=8192)

    # Case exercising a multi-step grid with a ragged last block (N*V = 150,
    # tm=64 -> grid of 3) and row tiles that span batch boundaries, checking
    # the in-kernel batch-select of the enc_c addend.
    _run_case(k2, N=3, V=50, h_dim=64, e_h_dim=64, e_c_dim=32, nc=5, out_dim=5,
              tm=64)

    print("KERNEL_OK")
</pallas_src>

<mosaic_0001>
module attributes {stable_mosaic.version = 11 : i64} {
  func.func @_prediction_kernel(%arg0: i32, %arg1: memref<16x32xf32, #tpu.memory_space<vmem>>, %arg2: memref<32x32xbf16, #tpu.memory_space<vmem>>, %arg3: memref<1x32xf32, #tpu.memory_space<vmem>>, %arg4: memref<32x5xf32, #tpu.memory_space<vmem>>, %arg5: memref<2x5xf32, #tpu.memory_space<vmem>>, %arg6: memref<16x5xf32, #tpu.memory_space<vmem>>) attributes {dimension_semantics = [#tpu.dimension_semantics<parallel>], iteration_bounds = array<i64: 1>, scalar_prefetch = 0 : i64, scratch_operands = 0 : i64, tpu.core_type = #tpu.core_type<tc>, window_params = [{transform_indices = @transform_0, window_bounds = array<i64: 16, 32>}, {pipeline_mode = #tpu.pipeline_mode<synchronous>, transform_indices = @transform_1, window_bounds = array<i64: 32, 32>}, {pipeline_mode = #tpu.pipeline_mode<synchronous>, transform_indices = @transform_2, window_bounds = array<i64: 1, 32>}, {pipeline_mode = #tpu.pipeline_mode<synchronous>, transform_indices = @transform_3, window_bounds = array<i64: 32, 5>}, {pipeline_mode = #tpu.pipeline_mode<synchronous>, transform_indices = @transform_4, window_bounds = array<i64: 2, 5>}, {transform_indices = @transform_5, window_bounds = array<i64: 16, 5>}]} {
    %c0 = arith.constant 0 : index
    %c0_0 = arith.constant 0 : index
    %0 = vector.load %arg1[%c0, %c0_0] : memref<16x32xf32, #tpu.memory_space<vmem>>, vector<16x32xf32>
    %1 = arith.truncf %0 : vector<16x32xf32> to vector<16x32xbf16>
    %c0_1 = arith.constant 0 : index
    %c0_2 = arith.constant 0 : index
    %2 = vector.load %arg2[%c0_1, %c0_2] : memref<32x32xbf16, #tpu.memory_space<vmem>>, vector<32x32xbf16>
    %cst = arith.constant dense<0.000000e+00> : vector<16x32xf32>
    %3 = tpu.matmul %1, %2, %cst {dimension_numbers = #tpu.dot_dimension_numbers<[1], [0], [0], [1], [0, 0, 1, 1], [], []>} : vector<16x32xbf16>, vector<32x32xbf16>, vector<16x32xf32> -> vector<16x32xf32>
    %c0_3 = arith.constant 0 : index
    %c0_4 = arith.constant 0 : index
    %4 = vector.load %arg3[%c0_3, %c0_4] : memref<1x32xf32, #tpu.memory_space<vmem>>, vector<1x32xf32>
    %5 = vector.broadcast %4 : vector<1x32xf32> to vector<16x32xf32>
    %6 = arith.addf %3, %5 : vector<16x32xf32>
    %cst_5 = arith.constant 0.000000e+00 : f32
    %7 = vector.broadcast %cst_5 : f32 to vector<16x32xf32>
    %8 = arith.maximumf %6, %7 : vector<16x32xf32>
    %c0_6 = arith.constant 0 : index
    %c0_7 = arith.constant 0 : index
    %9 = vector.load %arg4[%c0_6, %c0_7] : memref<32x5xf32, #tpu.memory_space<vmem>>, vector<32x5xf32>
    %cst_8 = arith.constant dense<0.000000e+00> : vector<16x5xf32>
    %10 = tpu.matmul %8, %9, %cst_8 {dimension_numbers = #tpu.dot_dimension_numbers<[1], [0], [0], [1], [0, 0, 1, 1], [], []>} : vector<16x32xf32>, vector<32x5xf32>, vector<16x5xf32> -> vector<16x5xf32>
    %c16_i32 = arith.constant 16 : i32
    %11 = arith.muli %arg0, %c16_i32 : i32
    %12 = tpu.iota {dimensions = array<i32: 0>} : vector<16x2xi32>
    %13 = vector.broadcast %11 : i32 to vector<16x2xi32>
    %14 = arith.addi %13, %12 : vector<16x2xi32>
    %15 = tpu.iota {dimensions = array<i32: 1>} : vector<16x2xi32>
    %c8_i32 = arith.constant 8 : i32
    %16 = vector.broadcast %c8_i32 : i32 to vector<16x2xi32>
    %17 = arith.muli %15, %16 : vector<16x2xi32>
    %18 = arith.cmpi sge, %14, %17 : vector<16x2xi32>
    %c8_i32_9 = arith.constant 8 : i32
    %19 = vector.broadcast %c8_i32_9 : i32 to vector<16x2xi32>
    %20 = arith.addi %17, %19 : vector<16x2xi32>
    %21 = arith.cmpi slt, %14, %20 : vector<16x2xi32>
    %22 = arith.andi %18, %21 : vector<16x2xi1>
    %23 = arith.extui %22 : vector<16x2xi1> to vector<16x2xi32>
    %24 = arith.sitofp %23 : vector<16x2xi32> to vector<16x2xf32>
    %c0_10 = arith.constant 0 : index
    %c0_11 = arith.constant 0 : index
    %25 = vector.load %arg5[%c0_10, %c0_11] : memref<2x5xf32, #tpu.memory_space<vmem>>, vector<2x5xf32>
    %cst_12 = arith.constant dense<0.000000e+00> : vector<16x5xf32>
    %26 = tpu.matmul %24, %25, %cst_12 {dimension_numbers = #tpu.dot_dimension_numbers<[1], [0], [0], [1], [0, 0, 1, 1], [], []>} : vector<16x2xf32>, vector<2x5xf32>, vector<16x5xf32> -> vector<16x5xf32>
    %27 = arith.addf %10, %26 : vector<16x5xf32>
    %c0_13 = arith.constant 0 : index
    %c0_14 = arith.constant 0 : index
    %28 = vector.load %arg6[%c0_13, %c0_14] : memref<16x5xf32, #tpu.memory_space<vmem>>, vector<16x5xf32>
    tpu.vector_store %arg6[%c0_13, %c0_14], %27 {strides = array<i32>} : memref<16x5xf32, #tpu.memory_space<vmem>>, vector<16x5xf32>,
    return
  }
  func.func @transform_0(%arg0: i32) -> (i32, i32) {
    %c0_i32 = arith.constant 0 : i32
    %c0_i32_0 = arith.constant 0 : i32
    return %arg0, %c0_i32 : i32, i32
  }
  func.func @transform_1(%arg0: i32) -> (i32, i32) {
    %c0_i32 = arith.constant 0 : i32
    %c0_i32_0 = arith.constant 0 : i32
    %c0_i32_1 = arith.constant 0 : i32
    return %c0_i32, %c0_i32_0 : i32, i32
  }
  func.func @transform_2(%arg0: i32) -> (i32, i32) {
    %c0_i32 = arith.constant 0 : i32
    %c0_i32_0 = arith.constant 0 : i32
    %c0_i32_1 = arith.constant 0 : i32
    return %c0_i32, %c0_i32_0 : i32, i32
  }
  func.func @transform_3(%arg0: i32) -> (i32, i32) {
    %c0_i32 = arith.constant 0 : i32
    %c0_i32_0 = arith.constant 0 : i32
    %c0_i32_1 = arith.constant 0 : i32
    return %c0_i32, %c0_i32_0 : i32, i32
  }
  func.func @transform_4(%arg0: i32) -> (i32, i32) {
    %c0_i32 = arith.constant 0 : i32
    %c0_i32_0 = arith.constant 0 : i32
    %c0_i32_1 = arith.constant 0 : i32
    return %c0_i32, %c0_i32_0 : i32, i32
  }
  func.func @transform_5(%arg0: i32) -> (i32, i32) {
    %c0_i32 = arith.constant 0 : i32
    %c0_i32_0 = arith.constant 0 : i32
    return %arg0, %c0_i32 : i32, i32
  }
}

</mosaic_0001>

<bundles_post_ra>
// kernel: tpu_custom_call.1
= control target key start
LH: loop header
LB: loop body
LE: loop exit
PB: predicated region body
PF: predicated region fallthrough
CT: control target
= control target key end

     0   :  { %v355_v0 = vmov 0.0   ;;  %vm356_vm0 = vmmov 0   ;;  %vm127_vm1 = vcmask 1041408   ;;  %v99_v2 = vlaneseq  ;;  %s426_s1 = inlined_call_operand.vmem [shape: bf16[32,32], index: 1, kind: input, shape index: {}]   ;;  %s427_s0 = inlined_call_operand.vmem [shape: f32[16,32], index: 0, kind: input, shape index: {}]   ;;  %s428_s4 = inlined_call_operand.vmem [shape: f32[2,5], index: 4, kind: input, shape index: {}]   ;;  %s429_s3 = inlined_call_operand.vmem [shape: f32[32,5], index: 3, kind: input, shape index: {}]   ;;  %s430_s2 = inlined_call_operand.vmem [shape: f32[1,32], index: 2, kind: input, shape index: {}]   ;;  %s431_s5 = inlined_call_operand.vmem [shape: f32[16,5], index: 5, kind: output, shape index: {}]  }
   0x1   :  { %317 = vmatprep.subr.bf16.mxu0 %v355_v0  ;;  %v353_v1 = vld [vmem:[%s426_s1] sm:$0xff]   ;;  %321 = vmatprep.mubr.msk.bf16.mxu0 %vm356_vm0, %v355_v0  ;;  %v354_v3 = vld [vmem:[%s426_s1 + $0x8] sm:$0xff]   ;;  %vm47_vm2 = vcmask 261120   ;;  %vm120_vm6 = vcmask 15360   ;;  %v96_v18 = vld [vmem:[%s429_s3 + $0x10] sm:$0xff]  ;;  %vm287_vm10 = vcmask 39936  }
   0x2   :  { %318 = vmatpush3.bf16.msra.mxu0 %v353_v1  ;;  %v21_v4 = vld [vmem:[%s427_s0] sm:$0xff]  ;;  %v22_v5 = vld [vmem:[%s427_s0 + $0x8] sm:$0xff]  ;;  %v100_v7 = vshrl.u32 %v99_v2, 7  ;;  %v106_v8 = vand.u32 127, %v99_v2  ;;  %v97_v19 = vld [vmem:[%s429_s3 + $0x18] sm:$0xff] }
   0x3   :  { %v119_v6 = vld [vmem:[%s428_s4] sm:$0x3]  ;;  %319 = vmatprep.subr.bf16.mxu0 %v355_v0  ;;  %v95_v10 = vld [vmem:[%s429_s3 + $0x8] sm:$0xff]  ;;  %v23_v14 = vpack.c.bf16 %v22_v5, %v21_v4  ;;  %v345_v20 = vpack.c.bf16 %v97_v19, %v96_v18 }
   0x4   :  { %325 = vmatprep.subr.msk.mxu1 %vm127_vm1, %v119_v6  ;;  %v94_v9 = vld [vmem:[%s429_s3] sm:$0xff]  ;;  %v107_v11 = vmul.u32 8, %v106_v8  ;;  %v101_v13 = vadd.s32 8, %v100_v7 }
   0x5   :  { %326 = vmatpush3.msk.msra.mxu1 %vm127_vm1, %v119_v6  ;;  %v341_v12 = vpack.c.bf16 %v95_v10, %v94_v9  ;;  %v294_v21 = vld [vmem:[%s430_s2] ss:$0 sm:$0xff] }
   0x6   :  { %320 = vmatpush3.bf16.msra.mxu0 %v354_v3  ;;  %vm108_vm3 = vcmp.ge.s32.totalorder %v100_v7, %v107_v11  ;;  %v110_v15 = vadd.s32 8, %v107_v11  ;;  %vm109_vm4 = vcmp.ge.s32.totalorder %v101_v13, %v107_v11 }
   0x7   :  { %342 = vmatprep.subr.bf16.mxu1 %v341_v12 }
   0x8   :  { %vm111_vm5 = vcmp.lt.s32.totalorder %v100_v7, %v110_v15  ;;  %vm112_vm7 = vcmp.lt.s32.totalorder %v101_v13, %v110_v15 }
   0x9   :  { %322 = vmatmul.mubr.msk.bf16.vlgmr.msra.gmra.mrb[0].mxu0 %vm47_vm2, %v23_v14  ;;  %vm113_vm8 = vmand %vm108_vm3, %vm111_vm5 }
   0xa   :  { %v298_v16 = vsel %vm113_vm8, 1.0, %v355_v0  ;;  %vm114_vm9 = vmand %vm109_vm4, %vm112_vm7 }
   0xb   :  { %327 = vmatprep.mubr.msk.f32.mxu1 %vm120_vm6, %v298_v16  ;;  %v299_v17 = vsel %vm114_vm9, 1.0, %v355_v0 }
   0xc   :  { %328 = vmatmul.mubr.msk.f32.vlgmr.msra.gmra.mrb[0].mxu1 %vm120_vm6, %v299_v17 }
   0xd   :  { %344 = vmatpush3.bf16.msra.mxu1 %v341_v12 }
   0xe   :  { %346 = vmatprep.subr.bf16.mxu1 %v345_v20 }
  0x11   :  { %348 = vmatpush3.bf16.msra.mxu1 %v345_v20 }
  0xdc   :  { %v85_v22 = vpop.f32.mrb[0].mxu0 }
  0xdd   :  { %v86_v23 = vadd.f32 %v294_v21, %v85_v22  ;;  %v323_v24 = vpop.f32.mrb[1].mxu0 }
  0xde   :  { %v88_v25 = vpop.f32.mrb[2].mxu0 }
  0xdf   :  { %v92_v26 = vmax.f32 %v86_v23, 0.0  ;;  %v89_v27 = vadd.f32 %v294_v21, %v88_v25  ;;  %v324_v28 = vpop.f32.mrb[3].mxu0 }
  0xe1   :  { %v93_v29 = vmax.f32 %v89_v27, 0.0  ;;  %338 = vmatprep.mubr.msk.f32.mxu1 %vm47_vm2, %v92_v26 }
  0xe3   :  { %339 = vmatmul.mubr.msk.f32.vlgmr.msra.gmra.mrb[0].mxu1 %vm47_vm2, %v93_v29 }
 0x1b6   :  { %v340_v30 = vpop.f32.mrb[0].mxu1 }
 0x1b7   :  { %289 = vst.msk [vmem:[%s431_s5 + $0x8] sm:$0xff] %vm287_vm10, %v340_v30  ;;  %v278_v31 = vpop.f32.mrb[1].mxu1 }
 0x1b8   :  { %288 = vst.msk [vmem:[%s431_s5] sm:$0xff] %vm287_vm10, %v278_v31 }

</bundles_post_ra>
